<compile_context>
chip_gen: v7x
topology: tpu7x:2x2x1
jax: 0.10.0
libtpu: 0.0.40
codegen_flags: <defaults>
</compile_context>

<pallas_src>
import functools

import jax
import jax.numpy as jnp
from jax.experimental import pallas as pl
from jax.experimental.pallas import tpu as pltpu


LANES = 128
BOX_LANES = 4                       # [x1, y1, x2, y2]
BOXES_PER_ROW = LANES // BOX_LANES  # 32 boxes per 128-lane row
# (MAX_TILE_ROWS, 128) f32 block = 2 MiB; 2 inputs x 2 pipeline buffers = 8 MiB.
MAX_TILE_ROWS = 4096

_SHIFT2 = (-2) % LANES  # roll so lane l sees lane l+2 (x2/y2 onto x1/y1 lanes)
_SHIFT1 = (-1) % LANES  # roll so lane l sees lane l+1 (h onto the w lane)


def _iou_loss_kernel(p_ref, b_ref, o_ref, *, eps, n_valid, tiles_per_split,
                     tail_tile):
    # p_ref, b_ref: (tile_r, 128) f32 lane-interleaved blocks (32 boxes / row).
    # o_ref:        (1, 128) f32 per-lane accumulator, resident across the
    #               reduction axis; only lanes l % 4 == 0 hold real loss sums.
    c = pl.program_id(0)            # parallel split (megacore on v7x)
    i = pl.program_id(1)            # reduction step along the box-row axis
    tile_idx = c * tiles_per_split + i
    tile_r = p_ref.shape[0]

    @pl.when(i == 0)
    def _init():
        o_ref[...] = jnp.zeros_like(o_ref)

    p = p_ref[...]
    b = b_ref[...]

    lane = jax.lax.broadcasted_iota(jnp.int32, (tile_r, LANES), 1)
    is_lo = (lane & 3) < 2          # x1/y1 lanes vs x2/y2 lanes

    # Intersection corners: element-wise max on x1/y1 lanes, min on x2/y2.
    inter = jnp.where(is_lo, jnp.maximum(p, b), jnp.minimum(p, b))

    def span(v):
        # lane l (l%4 in {0,1}) gets v[l+2] - v[l] + 1  ==  x2-x1+1 / y2-y1+1
        return pltpu.roll(v, shift=_SHIFT2, axis=1) - v + 1.0

    wh_i = jnp.maximum(span(inter), 0.0)   # clamp only the intersection span
    wh_p = span(p)
    wh_b = span(b)

    def area(wh):
        # lane l (l%4 == 0) gets w * h
        return wh * pltpu.roll(wh, shift=_SHIFT1, axis=1)

    inters = area(wh_i)
    uni = area(wh_p) + area(wh_b) - inters
    # Exact f32 divide kept to match the torch numerics; pl.reciprocal(uni,
    # approx=True) is a free EUP op if ~2^-12 relative error is acceptable.
    ious = jnp.maximum(inters / uni, eps)
    loss = -jnp.log(ious)
    # Lanes with l % 4 != 0 hold garbage (wrapped spans); they stay isolated
    # in their own accumulator lanes and are dropped by the wrapper.

    @pl.when(tile_idx < tail_tile)
    def _acc_full():                # interior tiles: every box is valid
        o_ref[...] += jnp.sum(loss, axis=0, keepdims=True)

    @pl.when(tile_idx >= tail_tile)
    def _acc_tail():                # ragged tail tile (and any overhang tile)
        row = jax.lax.broadcasted_iota(jnp.int32, (tile_r, LANES), 0)
        box_idx = (tile_idx * tile_r + row) * BOXES_PER_ROW + (lane >> 2)
        masked = jnp.where(box_idx < n_valid, loss, 0.0)
        o_ref[...] += jnp.sum(masked, axis=0, keepdims=True)


def iou_loss_pallas(preds, bbox, eps=1e-7, reduction="mean",
                    max_tile_rows=MAX_TILE_ROWS):
    """preds, bbox: (N, 4) float32 boxes -> scalar loss (matches torch module)."""
    assert preds.shape == bbox.shape and preds.ndim == 2 \
        and preds.shape[1] == BOX_LANES
    if reduction not in ("mean", "sum"):
        raise NotImplementedError
    n = preds.shape[0]

    # Lane-interleaved view: row-major reshape to (rows, 128), 32 boxes/row.
    # No transpose; only a <32-box ragged tail needs zero padding.
    # TODO(synk): a producer emitting N as a multiple of 32 (or coordinate-
    # major (4, N) data) removes even this small pad copy.
    boxes_pad = pl.cdiv(n, BOXES_PER_ROW) * BOXES_PER_ROW
    rows = boxes_pad // BOXES_PER_ROW

    def to_rows(x):
        x = x.astype(jnp.float32)
        if boxes_pad != n:
            x = jnp.pad(x, ((0, boxes_pad - n), (0, 0)))
        return x.reshape(rows, LANES)

    p_r = to_rows(preds)
    b_r = to_rows(bbox)

    # Tile geometry: tiny arrays get one block equal to the full array (no
    # out-of-bounds rows at all); larger arrays use 8-row-aligned tiles sized
    # to give at least 2 tiles (so both v7x TensorCores have work), capped at
    # max_tile_rows; the ragged last tile is masked in-kernel.
    if rows <= 16 and rows <= max_tile_rows:
        tile_r = rows
    else:
        tile_r = min(max_tile_rows, pl.cdiv(pl.cdiv(rows, 8), 2) * 8)
        tile_r = max(tile_r, 8)
    num_tiles = pl.cdiv(rows, tile_r)

    # Always split across 2 cores when there is >1 tile; an overhang tile on
    # the second split (odd tile count) is index-clamped and fully masked.
    n_split = 2 if num_tiles >= 2 else 1
    tiles_per_split = pl.cdiv(num_tiles, n_split)
    tail_tile = num_tiles - 1

    def in_map(c, i):
        t = jnp.minimum(c * tiles_per_split + i, num_tiles - 1)
        return (t, 0)

    kernel = functools.partial(
        _iou_loss_kernel,
        eps=float(eps),
        n_valid=n,
        tiles_per_split=tiles_per_split,
        tail_tile=tail_tile,
    )

    partials = pl.pallas_call(
        kernel,
        out_shape=jax.ShapeDtypeStruct((1, n_split * LANES), jnp.float32),
        grid=(n_split, tiles_per_split),
        in_specs=[
            pl.BlockSpec((tile_r, LANES), in_map),
            pl.BlockSpec((tile_r, LANES), in_map),
        ],
        out_specs=pl.BlockSpec((1, LANES), lambda c, i: (0, c)),
        compiler_params=pltpu.CompilerParams(
            dimension_semantics=("parallel", "arbitrary"),
        ),
    )(p_r, b_r)

    # Only lanes l % 4 == 0 carry real per-box loss sums; drop the junk lanes.
    per_box_lane = partials.reshape(n_split * BOXES_PER_ROW, BOX_LANES)[:, 0]
    total = jnp.sum(per_box_lane)
    if reduction == "mean":
        total = total / n
    return total


def iou_loss_ref(preds, bbox, eps=1e-7, reduction="mean"):
    x1 = jnp.maximum(preds[:, 0], bbox[:, 0])
    y1 = jnp.maximum(preds[:, 1], bbox[:, 1])
    x2 = jnp.minimum(preds[:, 2], bbox[:, 2])
    y2 = jnp.minimum(preds[:, 3], bbox[:, 3])
    w = jnp.clip(x2 - x1 + 1.0, 0.0)
    h = jnp.clip(y2 - y1 + 1.0, 0.0)
    inters = w * h
    uni = ((preds[:, 2] - preds[:, 0] + 1.0) * (preds[:, 3] - preds[:, 1] + 1.0)
           + (bbox[:, 2] - bbox[:, 0] + 1.0) * (bbox[:, 3] - bbox[:, 1] + 1.0)
           - inters)
    ious = jnp.maximum(inters / uni, eps)
    loss = -jnp.log(ious)
    return jnp.mean(loss) if reduction == "mean" else jnp.sum(loss)


def _make_boxes(key, n):
    k1, k2 = jax.random.split(key, 2)
    xy = jax.random.uniform(k1, (n, 2), minval=0.0, maxval=32.0)
    wh = jax.random.uniform(k2, (n, 2), minval=2.0, maxval=16.0)
    return jnp.concatenate([xy, xy + wh], axis=1).astype(jnp.float32)


if __name__ == "__main__":
    key = jax.random.PRNGKey(0)
    k1, k2, k3, k4, k5, k6 = jax.random.split(key, 6)

    # Small shape matching the module's (N, 4) box inputs (single exact tile).
    N = 16
    preds = _make_boxes(k1, N)
    bbox = _make_boxes(k2, N)
    loss = jax.block_until_ready(
        iou_loss_pallas(preds, bbox, eps=1e-7, reduction="mean"))
    ref = iou_loss_ref(preds, bbox, eps=1e-7, reduction="mean")
    assert jnp.allclose(loss, ref, rtol=1e-5, atol=1e-5), (loss, ref)

    # Ragged size: exercises the <32-box pad, the tail mask and 'sum'.
    N2 = 300
    preds2 = _make_boxes(k3, N2)
    bbox2 = _make_boxes(k4, N2)
    loss2 = jax.block_until_ready(
        iou_loss_pallas(preds2, bbox2, eps=1e-7, reduction="sum"))
    ref2 = iou_loss_ref(preds2, bbox2, eps=1e-7, reduction="sum")
    assert jnp.allclose(loss2, ref2, rtol=1e-5, atol=1e-4), (loss2, ref2)

    # Multi-tile path with forced small tiles: 72 rows / 9 tiles -> 2-way
    # parallel split with an odd overhang tile (clamped index map + full mask).
    N3 = 2304
    preds3 = _make_boxes(k5, N3)
    bbox3 = _make_boxes(k6, N3)
    loss3 = jax.block_until_ready(
        iou_loss_pallas(preds3, bbox3, eps=1e-7, reduction="mean",
                        max_tile_rows=8))
    ref3 = iou_loss_ref(preds3, bbox3, eps=1e-7, reduction="mean")
    assert jnp.allclose(loss3, ref3, rtol=1e-5, atol=1e-4), (loss3, ref3)

    print("KERNEL_OK")
</pallas_src>

<mosaic_0001>
module attributes {stable_mosaic.version = 11 : i64} {
  func.func @_iou_loss_kernel(%arg0: i32, %arg1: i32, %arg2: memref<1x128xf32, #tpu.memory_space<vmem>>, %arg3: memref<1x128xf32, #tpu.memory_space<vmem>>, %arg4: memref<1x128xf32, #tpu.memory_space<vmem>>) attributes {dimension_semantics = [#tpu.dimension_semantics<parallel>, #tpu.dimension_semantics<arbitrary>], iteration_bounds = array<i64: 1, 1>, scalar_prefetch = 0 : i64, scratch_operands = 0 : i64, tpu.core_type = #tpu.core_type<tc>, window_params = [{transform_indices = @transform_0, window_bounds = array<i64: 1, 128>}, {transform_indices = @transform_1, window_bounds = array<i64: 1, 128>}, {transform_indices = @transform_2, window_bounds = array<i64: 1, 128>}]} {
    %c1_i32 = arith.constant 1 : i32
    %0 = arith.muli %arg0, %c1_i32 : i32
    %1 = arith.addi %0, %arg1 : i32
    %c0_i32 = arith.constant 0 : i32
    %2 = arith.cmpi eq, %arg1, %c0_i32 : i32
    %3 = arith.extui %2 : i1 to i32
    %c0_i32_0 = arith.constant 0 : i32
    %4 = arith.cmpi ne, %3, %c0_i32_0 : i32
    scf.if %4 {
      %cst_17 = arith.constant 0.000000e+00 : f32
      %49 = vector.broadcast %cst_17 : f32 to vector<1x128xf32>
      %c0_18 = arith.constant 0 : index
      %c0_19 = arith.constant 0 : index
      %50 = vector.load %arg4[%c0_18, %c0_19] : memref<1x128xf32, #tpu.memory_space<vmem>>, vector<1x128xf32>
      tpu.vector_store %arg4[%c0_18, %c0_19], %49 {strides = array<i32>} : memref<1x128xf32, #tpu.memory_space<vmem>>, vector<1x128xf32>,
    } else {
    }
    %c0 = arith.constant 0 : index
    %c0_1 = arith.constant 0 : index
    %5 = vector.load %arg2[%c0, %c0_1] : memref<1x128xf32, #tpu.memory_space<vmem>>, vector<1x128xf32>
    %c0_2 = arith.constant 0 : index
    %c0_3 = arith.constant 0 : index
    %6 = vector.load %arg3[%c0_2, %c0_3] : memref<1x128xf32, #tpu.memory_space<vmem>>, vector<1x128xf32>
    %7 = tpu.iota {dimensions = array<i32: 1>} : vector<1x128xi32>
    %c3_i32 = arith.constant 3 : i32
    %8 = vector.broadcast %c3_i32 : i32 to vector<1x128xi32>
    %9 = arith.andi %7, %8 : vector<1x128xi32>
    %c2_i32 = arith.constant 2 : i32
    %10 = vector.broadcast %c2_i32 : i32 to vector<1x128xi32>
    %11 = arith.cmpi slt, %9, %10 : vector<1x128xi32>
    %12 = arith.maximumf %5, %6 : vector<1x128xf32>
    %13 = arith.minimumf %5, %6 : vector<1x128xf32>
    %14 = arith.select %11, %12, %13 : vector<1x128xi1>, vector<1x128xf32>
    %c126_i32 = arith.constant 126 : i32
    %15 = tpu.dynamic_rotate %14 by %c126_i32 dim 1 : vector<1x128xf32>, i32 -> vector<1x128xf32>
    %16 = arith.subf %15, %14 : vector<1x128xf32>
    %cst = arith.constant 1.000000e+00 : f32
    %17 = vector.broadcast %cst : f32 to vector<1x128xf32>
    %18 = arith.addf %16, %17 : vector<1x128xf32>
    %cst_4 = arith.constant 0.000000e+00 : f32
    %19 = vector.broadcast %cst_4 : f32 to vector<1x128xf32>
    %20 = arith.maximumf %18, %19 : vector<1x128xf32>
    %c126_i32_5 = arith.constant 126 : i32
    %21 = tpu.dynamic_rotate %5 by %c126_i32_5 dim 1 : vector<1x128xf32>, i32 -> vector<1x128xf32>
    %22 = arith.subf %21, %5 : vector<1x128xf32>
    %cst_6 = arith.constant 1.000000e+00 : f32
    %23 = vector.broadcast %cst_6 : f32 to vector<1x128xf32>
    %24 = arith.addf %22, %23 : vector<1x128xf32>
    %c126_i32_7 = arith.constant 126 : i32
    %25 = tpu.dynamic_rotate %6 by %c126_i32_7 dim 1 : vector<1x128xf32>, i32 -> vector<1x128xf32>
    %26 = arith.subf %25, %6 : vector<1x128xf32>
    %cst_8 = arith.constant 1.000000e+00 : f32
    %27 = vector.broadcast %cst_8 : f32 to vector<1x128xf32>
    %28 = arith.addf %26, %27 : vector<1x128xf32>
    %c127_i32 = arith.constant 127 : i32
    %29 = tpu.dynamic_rotate %20 by %c127_i32 dim 1 : vector<1x128xf32>, i32 -> vector<1x128xf32>
    %30 = arith.mulf %20, %29 : vector<1x128xf32>
    %c127_i32_9 = arith.constant 127 : i32
    %31 = tpu.dynamic_rotate %24 by %c127_i32_9 dim 1 : vector<1x128xf32>, i32 -> vector<1x128xf32>
    %32 = arith.mulf %24, %31 : vector<1x128xf32>
    %c127_i32_10 = arith.constant 127 : i32
    %33 = tpu.dynamic_rotate %28 by %c127_i32_10 dim 1 : vector<1x128xf32>, i32 -> vector<1x128xf32>
    %34 = arith.mulf %28, %33 : vector<1x128xf32>
    %35 = arith.addf %32, %34 : vector<1x128xf32>
    %36 = arith.subf %35, %30 : vector<1x128xf32>
    %37 = arith.divf %30, %36 : vector<1x128xf32>
    %cst_11 = arith.constant 1.000000e-07 : f32
    %38 = vector.broadcast %cst_11 : f32 to vector<1x128xf32>
    %39 = arith.maximumf %37, %38 : vector<1x128xf32>
    %40 = math.log %39 : vector<1x128xf32>
    %cst_12 = arith.constant 0.000000e+00 : f32
    %41 = vector.broadcast %cst_12 : f32 to vector<1x128xf32>
    %42 = arith.subf %41, %40 : vector<1x128xf32>
    %c0_i32_13 = arith.constant 0 : i32
    %43 = arith.cmpi slt, %1, %c0_i32_13 : i32
    %44 = arith.extui %43 : i1 to i32
    %c0_i32_14 = arith.constant 0 : i32
    %45 = arith.cmpi ne, %44, %c0_i32_14 : i32
    scf.if %45 {
      %c0_17 = arith.constant 0 : index
      %c0_18 = arith.constant 0 : index
      %49 = vector.load %arg4[%c0_17, %c0_18] : memref<1x128xf32, #tpu.memory_space<vmem>>, vector<1x128xf32>
      %cst_19 = arith.constant dense<0.000000e+00> : vector<128xf32>
      %50 = vector.multi_reduction <add>, %42, %cst_19 [0] : vector<1x128xf32> to vector<128xf32>
      %51 = vector.shape_cast %50 : vector<128xf32> to vector<1x128xf32>
      %52 = arith.addf %49, %51 : vector<1x128xf32>
      %c0_20 = arith.constant 0 : index
      %c0_21 = arith.constant 0 : index
      %53 = vector.load %arg4[%c0_20, %c0_21] : memref<1x128xf32, #tpu.memory_space<vmem>>, vector<1x128xf32>
      tpu.vector_store %arg4[%c0_20, %c0_21], %52 {strides = array<i32>} : memref<1x128xf32, #tpu.memory_space<vmem>>, vector<1x128xf32>,
    } else {
    }
    %c0_i32_15 = arith.constant 0 : i32
    %46 = arith.cmpi sge, %1, %c0_i32_15 : i32
    %47 = arith.extui %46 : i1 to i32
    %c0_i32_16 = arith.constant 0 : i32
    %48 = arith.cmpi ne, %47, %c0_i32_16 : i32
    scf.if %48 {
      %49 = tpu.iota {dimensions = array<i32: 0>} : vector<1x128xi32>
      %c1_i32_17 = arith.constant 1 : i32
      %50 = arith.muli %1, %c1_i32_17 : i32
      %51 = vector.broadcast %50 : i32 to vector<1x128xi32>
      %52 = arith.addi %51, %49 : vector<1x128xi32>
      %c32_i32 = arith.constant 32 : i32
      %53 = vector.broadcast %c32_i32 : i32 to vector<1x128xi32>
      %54 = arith.muli %52, %53 : vector<1x128xi32>
      %c2_i32_18 = arith.constant 2 : i32
      %55 = vector.broadcast %c2_i32_18 : i32 to vector<1x128xi32>
      %56 = arith.shrsi %7, %55 : vector<1x128xi32>
      %57 = arith.addi %54, %56 : vector<1x128xi32>
      %c16_i32 = arith.constant 16 : i32
      %58 = vector.broadcast %c16_i32 : i32 to vector<1x128xi32>
      %59 = arith.cmpi slt, %57, %58 : vector<1x128xi32>
      %cst_19 = arith.constant 0.000000e+00 : f32
      %60 = vector.broadcast %cst_19 : f32 to vector<1x128xf32>
      %61 = arith.select %59, %42, %60 : vector<1x128xi1>, vector<1x128xf32>
      %c0_20 = arith.constant 0 : index
      %c0_21 = arith.constant 0 : index
      %62 = vector.load %arg4[%c0_20, %c0_21] : memref<1x128xf32, #tpu.memory_space<vmem>>, vector<1x128xf32>
      %cst_22 = arith.constant dense<0.000000e+00> : vector<128xf32>
      %63 = vector.multi_reduction <add>, %61, %cst_22 [0] : vector<1x128xf32> to vector<128xf32>
      %64 = vector.shape_cast %63 : vector<128xf32> to vector<1x128xf32>
      %65 = arith.addf %62, %64 : vector<1x128xf32>
      %c0_23 = arith.constant 0 : index
      %c0_24 = arith.constant 0 : index
      %66 = vector.load %arg4[%c0_23, %c0_24] : memref<1x128xf32, #tpu.memory_space<vmem>>, vector<1x128xf32>
      tpu.vector_store %arg4[%c0_23, %c0_24], %65 {strides = array<i32>} : memref<1x128xf32, #tpu.memory_space<vmem>>, vector<1x128xf32>,
    } else {
    }
    return
  }
  func.func @transform_0(%arg0: i32, %arg1: i32) -> (i32, i32) {
    %c1_i32 = arith.constant 1 : i32
    %0 = arith.muli %arg0, %c1_i32 : i32
    %1 = arith.addi %0, %arg1 : i32
    %c0_i32 = arith.constant 0 : i32
    %2 = arith.minsi %1, %c0_i32 : i32
    %c0_i32_0 = arith.constant 0 : i32
    %c0_i32_1 = arith.constant 0 : i32
    return %2, %c0_i32_0 : i32, i32
  }
  func.func @transform_1(%arg0: i32, %arg1: i32) -> (i32, i32) {
    %c1_i32 = arith.constant 1 : i32
    %0 = arith.muli %arg0, %c1_i32 : i32
    %1 = arith.addi %0, %arg1 : i32
    %c0_i32 = arith.constant 0 : i32
    %2 = arith.minsi %1, %c0_i32 : i32
    %c0_i32_0 = arith.constant 0 : i32
    %c0_i32_1 = arith.constant 0 : i32
    return %2, %c0_i32_0 : i32, i32
  }
  func.func @transform_2(%arg0: i32, %arg1: i32) -> (i32, i32) {
    %c0_i32 = arith.constant 0 : i32
    %c0_i32_0 = arith.constant 0 : i32
    return %c0_i32, %arg0 : i32, i32
  }
}

</mosaic_0001>

<bundles_post_ra>
// kernel: tpu_custom_call.1
= control target key start
LH: loop header
LB: loop body
LE: loop exit
PB: predicated region body
PF: predicated region fallthrough
CT: control target
= control target key end

     0   :  { %7 = vsyncpa [#allocation3], 0  ;;  %s250_s0 = inlined_call_operand.hbm [shape: f32[1,128], index: 0, kind: input, shape index: {}]   ;;  %s251_s1 = inlined_call_operand.vmem [shape: f32[1,128], index: 1, kind: input, shape index: {}]   ;;  %s252_s2 = inlined_call_operand.hbm [shape: f32[1,128], index: 2, kind: output, shape index: {}]  }
   0x1   :  { %8 = vsyncpa [#allocation4], 0  ;;  %s203_s9 = smov [#allocation2]   ;;  %s155_s13 = scalar_lea.hbm %s250_s0, 16 }
   0x2   :  { %s20_s10 = sshll.u32 %s203_s9, 4  ;;  %p156_p0 = scmp.ne.s32.totalorder %s250_s0, %s155_s13  ;;  %s21_s10 = int_to_ptr.vmem [resolvable:$true] %s20_s10 }
   0x3   :  { %p159_p1 = scmp.lt.u32.totalorder %s155_s13, %s250_s0 }
   0x5   :  { %p161_p2 = pnand %p159_p1, %p156_p0 }
   0x7   :  { %164 = shalt.err (!%p161_p2)
}
   0x8   :  { %s165_s18 = scalar_lea.vmem %s21_s10, 16  ;;  %s169_s19 = scalar_lea.vmem %s21_s10, 32 }
   0x9   :  { %p166_p3 = scmp.ne.s32.totalorder %s21_s10, %s165_s18  ;;  %p170_p4 = scmp.lt.s32.totalorder %s21_s10, %s21_s10 }
   0xa   :  { %p171_p5 = scmp.lt.s32.totalorder %s169_s19, %s165_s18 }
   0xc   :  { %p172_p6 = por %p171_p5, %p170_p4 }
   0xe   :  { %p173_p7 = pnand %p172_p6, %p166_p3 }
  0x10   :  { %176 = shalt.err (!%p173_p7)
}
  0x11   :  { %23 = dma.hbm_to_vmem [thread:$0]  %s250_s0, 16, %s21_s10, [#allocation3]  }
  0x12   :  { %199 = dma.done.wait [#allocation3], 16  }
  0x13   :  { %200 = vsyncadd [#allocation3], 4294967280  ;;  %v64_v0 = vlaneseq  ;;  %v63_v3 = vld [vmem:[%s251_s1] sm:$0x1]  ;;  %s204_s24 = smov 126   ;;  %s205_s0 = smov 127  }
  0x14   :  { %v62_v4 = vld [vmem:[#allocation2] sm:$0x1]  ;;  %80 = vrot.lane.b32.xlu1 %v63_v3, %s204_s24  ;;  %v206_v21 = vmov 0.0   ;;  %s207_s1 = smov [#allocation5]  }
  0x15   :  { %v65_v1 = vand.u32 127, %v64_v0  ;;  %v68_v5 = vmax.f32 %v62_v4, %v63_v3  ;;  %v69_v6 = vmin.f32 %v62_v4, %v63_v3  ;;  %v114_v18 = vshrl.u32 %v64_v0, 7  ;;  %61 = vst [vmem:[#allocation5] sm:$0x1] %v206_v21  ;;  %s132_s25 = sshll.u32 %s207_s1, 4  ;;  %s133_s25 = int_to_ptr.vmem [resolvable:$true] %s132_s25 }
  0x16   :  { %s177_s26 = scalar_lea.vmem %s133_s25, 16  ;;  %s181_s27 = scalar_lea.vmem %s133_s25, 32 }
  0x17   :  { %v66_v2 = vand.u32 3, %v65_v1  ;;  %v117_v19 = vmul.u32 32, %v114_v18  ;;  %v118_v20 = vshra.s32 %v65_v1, 2  ;;  %p178_p8 = scmp.ne.s32.totalorder %s133_s25, %s177_s26  ;;  %p182_p9 = scmp.lt.s32.totalorder %s133_s25, %s133_s25 }
  0x18   :  { %p183_p10 = scmp.lt.s32.totalorder %s181_s27, %s177_s26 }
  0x19   :  { %vm67_vm0 = vcmp.lt.s32.totalorder %v66_v2, 2  ;;  %v119_v22 = vadd.s32 %v118_v20, %v117_v19 }
  0x1a   :  { %v70_v7 = vsel %vm67_vm0, %v68_v5, %v69_v6  ;;  %p184_p11 = por %p183_p10, %p182_p9 }
  0x1b   :  { %71 = vrot.lane.b32.xlu0 %v70_v7, %s204_s24  ;;  %vm120_vm1 = vcmp.lt.s32.totalorder %v119_v22, 16 }
  0x1c   :  { %v122_v37 = vld [vmem:[#allocation5] sm:$0x1]  ;;  %p185_p12 = pnand %p184_p11, %p178_p8 }
  0x1f   :  { %76 = vrot.lane.b32.xlu0 %v62_v4, %s204_s24 }
  0x86   :  { %v81_v8 = vpop.permute.xlu1 %80 }
  0x87   :  { %v82_v9 = vsub.f32 %v81_v8, %v63_v3 }
  0x89   :  { %v83_v10 = vadd.f32 1.0, %v82_v9 }
  0x8b   :  { %90 = vrot.lane.b32.xlu0 %v83_v10, %s205_s0 }
  0x8d   :  { %v72_v11 = vpop.permute.xlu0 %71 }
  0x8e   :  { %v73_v12 = vsub.f32 %v72_v11, %v70_v7 }
  0x90   :  { %v74_v15 = vadd.f32 1.0, %v73_v12 }
  0x91   :  { %v77_v13 = vpop.permute.xlu0 %76 }
  0x92   :  { %v78_v14 = vsub.f32 %v77_v13, %v62_v4  ;;  %v75_v17 = vmax.f32 %v74_v15, 0.0 }
  0x94   :  { %v79_v16 = vadd.f32 1.0, %v78_v14 }
  0x96   :  { %87 = vrot.lane.b32.xlu1 %v79_v16, %s205_s0 }
  0x9a   :  { %84 = vrot.lane.b32.xlu1 %v75_v17, %s205_s0 }
  0xfd   :  { %v91_v23 = vpop.permute.xlu0 %90 }
  0xfe   :  { %v92_v26 = vmul.f32 %v91_v23, %v83_v10 }
 0x108   :  { %v88_v24 = vpop.permute.xlu1 %87 }
 0x109   :  { %v89_v25 = vmul.f32 %v88_v24, %v79_v16 }
 0x10b   :  { %v93_v28 = vadd.f32 %v92_v26, %v89_v25 }
 0x10c   :  { %v85_v27 = vpop.permute.xlu1 %84 }
 0x10d   :  { %v86_v29 = vmul.f32 %v85_v27, %v75_v17 }
 0x10f   :  { %v94_v30 = vsub.f32 %v93_v28, %v86_v29 }
 0x111   :  { %151 = vrcp.f32 %v94_v30 }
 0x11b   :  { %v152_v31 = vpop.eup %151 }
 0x11c   :  { %v96_v32 = vmul.f32 %v152_v31, %v86_v29 }
 0x11e   :  { %v97_v33 = vmax.f32 %v96_v32, 1e-07 }
 0x120   :  { %153 = vlog2.f32 %v97_v33 }
 0x12a   :  { %v154_v34 = vpop.eup %153 }
 0x12b   :  { %v99_v35 = vmul.f32 0.6931472, %v154_v34 }
 0x12d   :  { %v100_v36 = vsub.f32 0.0, %v99_v35 }
 0x12f   :  { %v121_v38 = vsel %vm120_vm1, %v100_v36, 0.0 }
 0x130   :  { %v124_v39 = vadd.f32 %v122_v37, %v121_v38 }
 0x132   :  { %125 = vst [vmem:[#allocation5] sm:$0x1] %v124_v39 }
 0x133   :  { %188 = shalt.err (!%p185_p12)
}
 0x134   :  { %s189_s30 = scalar_lea.hbm %s252_s2, 16 }
 0x135   :  { %p190_p13 = scmp.ne.s32.totalorder %s252_s2, %s189_s30  ;;  %p193_p0 = scmp.lt.u32.totalorder %s189_s30, %s252_s2 }
 0x137   :  { %p195_p1 = pnand %p193_p0, %p190_p13 }
 0x139   :  { %198 = shalt.err (!%p195_p1)
}
 0x13a   :  { %135 = dma.vmem_to_hbm [thread:$0]  %s133_s25, 16, %s252_s2, [#allocation4]  }
 0x13b   :  { %201 = dma.done.wait [#allocation4], 16  }
 0x13c   :  { %202 = vsyncadd [#allocation4], 4294967280 }
 0x13d   :  { %139 = vsyncpa [#allocation3], 1 }
 0x13e   :  { %140 = vsyncpa [#allocation4], 1 }

</bundles_post_ra>
